<compile_context>
chip_gen: v7x
topology: tpu7x:2x2x1
jax: 0.10.0
libtpu: 0.0.40
codegen_flags: <defaults>
</compile_context>

<pallas_src>
import functools

import jax
import jax.numpy as jnp
from jax import lax
from jax.experimental import pallas as pl
from jax.experimental.pallas import tpu as pltpu


def _round_up(x, m):
    return ((x + m - 1) // m) * m


def _device_kind():
    try:
        return jax.devices()[0].device_kind.lower()
    except Exception:
        return ""


def _mae_kernel(pred_ref, labels_ref, out_ref, acc_ref, *,
                n_rows, block_rows, sub_rows, n_sub, blocks_per_core):
    # pred_ref:   (block_rows, C)       input dtype (cast to f32 per chunk)
    # labels_ref: (1, 1, block_rows)    int32, lane-dense, zero padded in wrapper
    # out_ref:    (1, 1, 1)             f32 per-core partial sum (written on last step)
    # acc_ref:    (1, 1)                f32 VMEM scratch accumulator (per core)
    c = pl.program_id(0)
    i = pl.program_id(1)

    @pl.when(i == 0)
    def _():
        acc_ref[...] = jnp.zeros_like(acc_ref)

    # Logical global row offset of this block.  Redundant blocks on the parallel
    # axis (their index is clamped in the index_map) land past n_rows and are
    # fully masked out below, as are the padded rows of the last partial block
    # (relies on Pallas not clamping the block origin for partial blocks).
    row0 = (c * blocks_per_core + i) * block_rows

    def chunk_partial(pred_blk, lbl_blk, r0):
        # pred_blk: (rows, C) input dtype; lbl_blk: (1, 1, rows) int32.
        pred = pred_blk.astype(jnp.float32)
        rows = pred.shape[0]
        # Lane-dense labels -> per-row column via a tiny XLU relayout.
        lbl_col = jnp.transpose(lbl_blk.reshape(1, rows), (1, 0))        # (rows, 1)

        # Numerically-stable softmax numerator; exp is the only full-width transcendental.
        m = jnp.max(pred, axis=1, keepdims=True)                         # (rows, 1)
        e = jnp.exp(pred - m)                                            # (rows, C)
        s = jnp.sum(e, axis=1, keepdims=True)                            # (rows, 1)

        # Gather the label-class numerator via a one-hot masked sum (no full-width divide).
        cls_idx = lax.broadcasted_iota(jnp.int32, pred.shape, 1)         # (rows, C)
        picked_num = jnp.sum(jnp.where(cls_idx == lbl_col, e, 0.0),
                             axis=1, keepdims=True)                      # (rows, 1)

        # Only the per-row scalar is divided (exact reciprocal) and clipped.
        picked = jnp.clip(picked_num * pl.reciprocal(s), 1e-7, 1.0 - 1e-7)

        # Mask rows past the true batch size (padded / redundant rows).
        row = row0 + r0 + lax.broadcasted_iota(jnp.int32, (rows, 1), 0)
        contrib = jnp.where(row < n_rows, 1.0 - picked, 0.0)             # (rows, 1)
        return jnp.sum(contrib, axis=0, keepdims=True)                   # (1, 1)

    if n_sub == 1:
        part = chunk_partial(pred_ref[...], labels_ref[...], 0)
    else:
        def body(j, carry):
            r0 = pl.multiple_of(j * sub_rows, sub_rows)
            return carry + chunk_partial(
                pred_ref[pl.ds(r0, sub_rows), :],
                labels_ref[:, :, pl.ds(r0, sub_rows)],
                r0)
        part = lax.fori_loop(0, n_sub, body, jnp.zeros((1, 1), jnp.float32))

    acc_ref[...] += part

    @pl.when(i == pl.num_programs(1) - 1)
    def _():
        out_ref[...] = acc_ref[...].reshape(1, 1, 1)


def mean_absolute_error(pred, labels, num_classes, *, block_rows=None, num_cores=None):
    """pred: (N, num_classes) float logits (f32 or bf16 streamed as-is),
    labels: (N,) int class ids.  Returns scalar f32 loss."""
    N, C = pred.shape
    assert C == num_classes
    itemsize = jnp.dtype(pred.dtype).itemsize
    lane_c = max(_round_up(C, 128), 128)          # lane padding of one pred row in VMEM
    align = max(8, 32 // itemsize)                # sublane alignment for the input dtype

    kind = _device_kind()
    if ("v2" in kind) or ("v3" in kind):
        vmem_budget, vmem_limit = 4 << 20, 14 << 20
    elif "7" in kind:                              # v7x: 64 MiB VMEM, 2 TCs
        vmem_budget, vmem_limit = 12 << 20, 32 << 20
    elif any(t in kind for t in ("v4", "v5", "v6")):
        vmem_budget, vmem_limit = 24 << 20, 64 << 20
    else:
        vmem_budget, vmem_limit = 8 << 20, 32 << 20

    if num_cores is None:
        num_cores = 2 if "7" in kind else 1        # 2-TC split only pays on v7x

    # Compute-chunk rows: keep per-chunk f32 intermediates around ~256 KiB.
    sub_rows = max(align, min(512, ((256 * 1024) // (lane_c * 4)) // align * align))
    n_padded = _round_up(N, align)

    if block_rows is None:
        if n_padded <= sub_rows:
            block_rows = n_padded
        else:
            # Budget: double-buffered pred stream + double-buffered lane-dense labels
            # (8-sublane padded) + a reserve for chunk-local f32 intermediates.
            per_row = 2 * lane_c * itemsize + 2 * 8 * 4
            reserve = 8 * sub_rows * lane_c * 4
            rows_cap = max(sub_rows, max(vmem_budget - reserve, 0) // per_row)
            block_rows = min(int(rows_cap), _round_up(n_padded, sub_rows), 32768)
            block_rows = max(sub_rows, (block_rows // sub_rows) * sub_rows)
    block_rows = max(align, (int(block_rows) // align) * align)
    if block_rows < sub_rows or block_rows % sub_rows != 0:
        sub_rows = block_rows                      # single-chunk fallback
    n_sub = block_rows // sub_rows

    num_blocks = pl.cdiv(N, block_rows)
    num_cores = int(max(1, min(num_cores, num_blocks)))
    blocks_per_core = pl.cdiv(num_blocks, num_cores)
    last_blk = num_blocks - 1

    # Lane-dense, zero-padded labels: one contiguous (1, 1, block_rows) burst per block.
    total_rows = num_blocks * block_rows
    labels_i32 = labels.astype(jnp.int32).reshape(N)
    labels_blk = jnp.pad(labels_i32, (0, total_rows - N)).reshape(num_blocks, 1, block_rows)

    def pred_map(c, i):
        return (jnp.minimum(c * blocks_per_core + i, last_blk), 0)

    def labels_map(c, i):
        return (jnp.minimum(c * blocks_per_core + i, last_blk), 0, 0)

    kernel = functools.partial(
        _mae_kernel, n_rows=N, block_rows=block_rows, sub_rows=sub_rows,
        n_sub=n_sub, blocks_per_core=blocks_per_core)

    cost = pl.CostEstimate(
        flops=5 * N * C,
        transcendentals=N * C,
        bytes_accessed=N * C * itemsize + total_rows * 4 + num_cores * 4,
    )

    partials = pl.pallas_call(
        kernel,
        out_shape=jax.ShapeDtypeStruct((num_cores, 1, 1), jnp.float32),
        grid=(num_cores, blocks_per_core),
        in_specs=[
            pl.BlockSpec((block_rows, C), pred_map),
            pl.BlockSpec((1, 1, block_rows), labels_map),
        ],
        out_specs=pl.BlockSpec((1, 1, 1), lambda c, i: (c, 0, 0)),
        scratch_shapes=[pltpu.VMEM((1, 1), jnp.float32)],
        compiler_params=pltpu.CompilerParams(
            dimension_semantics=("parallel", "arbitrary"),
            vmem_limit_bytes=vmem_limit),
        cost_estimate=cost,
    )(pred, labels_blk)

    return jnp.sum(partials) / N


def _reference(pred, labels, num_classes):
    probs = jnp.clip(jax.nn.softmax(pred.astype(jnp.float32), axis=1), 1e-7, 1.0 - 1e-7)
    oh = jax.nn.one_hot(labels, num_classes, dtype=jnp.float32)
    return jnp.mean(1.0 - jnp.sum(oh * probs, axis=1))


if __name__ == "__main__":
    key = jax.random.PRNGKey(0)
    k1, k2, k3, k4 = jax.random.split(key, 4)

    # Case 1: small aligned batch, fully automatic tiling / core split.
    N, C = 8, 32
    pred = jax.random.normal(k1, (N, C), dtype=jnp.float32)
    labels = jax.random.randint(k2, (N,), 0, C, dtype=jnp.int32)
    loss = jax.block_until_ready(mean_absolute_error(pred, labels, num_classes=C))
    ref = _reference(pred, labels, C)
    assert jnp.allclose(loss, ref, atol=1e-6, rtol=1e-6), (loss, ref)

    # Case 2: batch not a multiple of the tile -> multi-step accumulation plus
    # masking of the padded rows in the last block (forced tiny block).
    N2, C2 = 20, 32
    pred2 = jax.random.normal(k3, (N2, C2), dtype=jnp.float32)
    labels2 = jax.random.randint(k4, (N2,), 0, C2, dtype=jnp.int32)
    loss2 = jax.block_until_ready(
        mean_absolute_error(pred2, labels2, num_classes=C2, block_rows=8, num_cores=1))
    ref2 = _reference(pred2, labels2, C2)
    assert jnp.allclose(loss2, ref2, atol=1e-6, rtol=1e-6), (loss2, ref2)

    # Case 3: forced 2-way core split with an odd block count (exercises the
    # clamped index map and per-core partial sums; correct on any generation).
    loss3 = jax.block_until_ready(
        mean_absolute_error(pred2, labels2, num_classes=C2, block_rows=8, num_cores=2))
    assert jnp.allclose(loss3, ref2, atol=1e-6, rtol=1e-6), (loss3, ref2)

    print("KERNEL_OK")
</pallas_src>

<mosaic_0001>
module attributes {stable_mosaic.version = 11 : i64} {
  func.func @_mae_kernel(%arg0: i32, %arg1: i32, %arg2: memref<8x32xf32, #tpu.memory_space<vmem>>, %arg3: memref<1x1x8xi32, #tpu.memory_space<vmem>>, %arg4: memref<1x1x1xf32, #tpu.memory_space<vmem>>, %arg5: memref<1x1xf32, #tpu.memory_space<vmem>>) attributes {dimension_semantics = [#tpu.dimension_semantics<parallel>, #tpu.dimension_semantics<arbitrary>], iteration_bounds = array<i64: 1, 1>, scalar_prefetch = 0 : i64, scratch_operands = 1 : i64, tpu.core_type = #tpu.core_type<tc>, window_params = [{transform_indices = @transform_0, window_bounds = array<i64: 8, 32>}, {transform_indices = @transform_1, window_bounds = array<i64: 1, 1, 8>}, {transform_indices = @transform_2, window_bounds = array<i64: 1, 1, 1>}]} {
    %c0_i32 = arith.constant 0 : i32
    %0 = arith.cmpi eq, %arg1, %c0_i32 : i32
    %1 = arith.extui %0 : i1 to i32
    %c0_i32_0 = arith.constant 0 : i32
    %2 = arith.cmpi ne, %1, %c0_i32_0 : i32
    scf.if %2 {
      %cst_21 = arith.constant 0.000000e+00 : f32
      %48 = vector.broadcast %cst_21 : f32 to vector<1x1xf32>
      %c0_22 = arith.constant 0 : index
      %c0_23 = arith.constant 0 : index
      %49 = vector.load %arg5[%c0_22, %c0_23] : memref<1x1xf32, #tpu.memory_space<vmem>>, vector<1x1xf32>
      tpu.vector_store %arg5[%c0_22, %c0_23], %48 {strides = array<i32>} : memref<1x1xf32, #tpu.memory_space<vmem>>, vector<1x1xf32>,
    } else {
    }
    %c1_i32 = arith.constant 1 : i32
    %3 = arith.muli %arg0, %c1_i32 : i32
    %4 = arith.addi %3, %arg1 : i32
    %c8_i32 = arith.constant 8 : i32
    %5 = arith.muli %4, %c8_i32 : i32
    %c0 = arith.constant 0 : index
    %c0_1 = arith.constant 0 : index
    %6 = vector.load %arg2[%c0, %c0_1] : memref<8x32xf32, #tpu.memory_space<vmem>>, vector<8x32xf32>
    %c0_2 = arith.constant 0 : index
    %c0_3 = arith.constant 0 : index
    %c0_4 = arith.constant 0 : index
    %7 = vector.load %arg3[%c0_2, %c0_3, %c0_4] : memref<1x1x8xi32, #tpu.memory_space<vmem>>, vector<1x1x8xi32>
    %8 = vector.shape_cast %7 : vector<1x1x8xi32> to vector<1x8xi32>
    %9 = tpu.transpose %8, [1, 0] : vector<1x8xi32> -> vector<8x1xi32>
    %cst = arith.constant dense<0xFF800000> : vector<8xf32>
    %10 = vector.multi_reduction <maximumf>, %6, %cst [1] : vector<8x32xf32> to vector<8xf32>
    %11 = vector.shape_cast %10 : vector<8xf32> to vector<8x1xf32>
    %12 = vector.broadcast %11 : vector<8x1xf32> to vector<8x32xf32>
    %13 = arith.subf %6, %12 : vector<8x32xf32>
    %14 = math.exp %13 : vector<8x32xf32>
    %cst_5 = arith.constant dense<0.000000e+00> : vector<8xf32>
    %15 = vector.multi_reduction <add>, %14, %cst_5 [1] : vector<8x32xf32> to vector<8xf32>
    %16 = vector.shape_cast %15 : vector<8xf32> to vector<8x1xf32>
    %17 = tpu.iota {dimensions = array<i32: 1>} : vector<8x32xi32>
    %18 = vector.broadcast %9 : vector<8x1xi32> to vector<8x32xi32>
    %19 = arith.cmpi eq, %17, %18 : vector<8x32xi32>
    %cst_6 = arith.constant 0.000000e+00 : f32
    %20 = vector.broadcast %cst_6 : f32 to vector<8x32xf32>
    %21 = arith.select %19, %14, %20 : vector<8x32xi1>, vector<8x32xf32>
    %cst_7 = arith.constant dense<0.000000e+00> : vector<8xf32>
    %22 = vector.multi_reduction <add>, %21, %cst_7 [1] : vector<8x32xf32> to vector<8xf32>
    %23 = vector.shape_cast %22 : vector<8xf32> to vector<8x1xf32>
    %24 = tpu.reciprocal %16 : vector<8x1xf32> -> vector<8x1xf32>
    %25 = arith.mulf %23, %24 : vector<8x1xf32>
    %cst_8 = arith.constant 1.000000e-07 : f32
    %cst_9 = arith.constant 0.99999988 : f32
    %26 = vector.broadcast %cst_8 : f32 to vector<8x1xf32>
    %27 = arith.maximumf %26, %25 : vector<8x1xf32>
    %28 = vector.broadcast %cst_9 : f32 to vector<8x1xf32>
    %29 = arith.minimumf %28, %27 : vector<8x1xf32>
    %c0_i32_10 = arith.constant 0 : i32
    %30 = arith.addi %5, %c0_i32_10 : i32
    %31 = tpu.iota {dimensions = array<i32: 0>} : vector<8x1xi32>
    %32 = vector.broadcast %30 : i32 to vector<8x1xi32>
    %33 = arith.addi %32, %31 : vector<8x1xi32>
    %c8_i32_11 = arith.constant 8 : i32
    %34 = vector.broadcast %c8_i32_11 : i32 to vector<8x1xi32>
    %35 = arith.cmpi slt, %33, %34 : vector<8x1xi32>
    %cst_12 = arith.constant 1.000000e+00 : f32
    %36 = vector.broadcast %cst_12 : f32 to vector<8x1xf32>
    %37 = arith.subf %36, %29 : vector<8x1xf32>
    %cst_13 = arith.constant 0.000000e+00 : f32
    %38 = vector.broadcast %cst_13 : f32 to vector<8x1xf32>
    %39 = arith.select %35, %37, %38 : vector<8x1xi1>, vector<8x1xf32>
    %cst_14 = arith.constant dense<0.000000e+00> : vector<1xf32>
    %40 = vector.multi_reduction <add>, %39, %cst_14 [0] : vector<8x1xf32> to vector<1xf32>
    %41 = vector.shape_cast %40 : vector<1xf32> to vector<1x1xf32>
    %c0_15 = arith.constant 0 : index
    %c0_16 = arith.constant 0 : index
    %42 = vector.load %arg5[%c0_15, %c0_16] : memref<1x1xf32, #tpu.memory_space<vmem>>, vector<1x1xf32>
    %43 = arith.addf %42, %41 : vector<1x1xf32>
    %c0_17 = arith.constant 0 : index
    %c0_18 = arith.constant 0 : index
    %44 = vector.load %arg5[%c0_17, %c0_18] : memref<1x1xf32, #tpu.memory_space<vmem>>, vector<1x1xf32>
    tpu.vector_store %arg5[%c0_17, %c0_18], %43 {strides = array<i32>} : memref<1x1xf32, #tpu.memory_space<vmem>>, vector<1x1xf32>,
    %c0_i32_19 = arith.constant 0 : i32
    %45 = arith.cmpi eq, %arg1, %c0_i32_19 : i32
    %46 = arith.extui %45 : i1 to i32
    %c0_i32_20 = arith.constant 0 : i32
    %47 = arith.cmpi ne, %46, %c0_i32_20 : i32
    scf.if %47 {
      %c0_21 = arith.constant 0 : index
      %c0_22 = arith.constant 0 : index
      %48 = vector.load %arg5[%c0_21, %c0_22] : memref<1x1xf32, #tpu.memory_space<vmem>>, vector<1x1xf32>
      %49 = vector.shape_cast %48 : vector<1x1xf32> to vector<1x1x1xf32>
      %c0_23 = arith.constant 0 : index
      %c0_24 = arith.constant 0 : index
      %c0_25 = arith.constant 0 : index
      %50 = vector.load %arg4[%c0_23, %c0_24, %c0_25] : memref<1x1x1xf32, #tpu.memory_space<vmem>>, vector<1x1x1xf32>
      tpu.vector_store %arg4[%c0_23, %c0_24, %c0_25], %49 {strides = array<i32>} : memref<1x1x1xf32, #tpu.memory_space<vmem>>, vector<1x1x1xf32>,
    } else {
    }
    return
  }
  func.func @transform_0(%arg0: i32, %arg1: i32) -> (i32, i32) {
    %c1_i32 = arith.constant 1 : i32
    %0 = arith.muli %arg0, %c1_i32 : i32
    %1 = arith.addi %0, %arg1 : i32
    %c0_i32 = arith.constant 0 : i32
    %2 = arith.minsi %1, %c0_i32 : i32
    %c0_i32_0 = arith.constant 0 : i32
    %c0_i32_1 = arith.constant 0 : i32
    return %2, %c0_i32_0 : i32, i32
  }
  func.func @transform_1(%arg0: i32, %arg1: i32) -> (i32, i32, i32) {
    %c1_i32 = arith.constant 1 : i32
    %0 = arith.muli %arg0, %c1_i32 : i32
    %1 = arith.addi %0, %arg1 : i32
    %c0_i32 = arith.constant 0 : i32
    %2 = arith.minsi %1, %c0_i32 : i32
    %c0_i32_0 = arith.constant 0 : i32
    %c0_i32_1 = arith.constant 0 : i32
    %c0_i32_2 = arith.constant 0 : i32
    return %2, %c0_i32_0, %c0_i32_1 : i32, i32, i32
  }
  func.func @transform_2(%arg0: i32, %arg1: i32) -> (i32, i32, i32) {
    %c0_i32 = arith.constant 0 : i32
    %c0_i32_0 = arith.constant 0 : i32
    %c0_i32_1 = arith.constant 0 : i32
    return %arg0, %c0_i32, %c0_i32_0 : i32, i32, i32
  }
}

</mosaic_0001>

<bundles_post_ra>
// kernel: tpu_custom_call.1
= control target key start
LH: loop header
LB: loop body
LE: loop exit
PB: predicated region body
PF: predicated region fallthrough
CT: control target
= control target key end

     0   :  { %7 = vsyncpa [#allocation4], 0  ;;  %s274_s0 = inlined_call_operand.hbm [shape: f32[8,32], index: 0, kind: input, shape index: {}]   ;;  %s275_s1 = inlined_call_operand.vmem [shape: s32[1,1,8], index: 1, kind: input, shape index: {}]   ;;  %s276_s2 = inlined_call_operand.hbm [shape: f32[1,1,1], index: 2, kind: output, shape index: {}]  }
   0x1   :  { %8 = vsyncpa [#allocation5], 0  ;;  %s222_s9 = smov [#allocation3]   ;;  %s174_s13 = scalar_lea.hbm %s274_s0, 128 }
   0x2   :  { %s20_s10 = sshll.u32 %s222_s9, 4  ;;  %p175_p0 = scmp.ne.s32.totalorder %s274_s0, %s174_s13  ;;  %s21_s10 = int_to_ptr.vmem [resolvable:$true] %s20_s10 }
   0x3   :  { %p178_p1 = scmp.lt.u32.totalorder %s174_s13, %s274_s0 }
   0x5   :  { %p180_p2 = pnand %p178_p1, %p175_p0 }
   0x7   :  { %183 = shalt.err (!%p180_p2)
}
   0x8   :  { %s184_s18 = scalar_lea.vmem %s21_s10, 128  ;;  %p189_p4 = scmp.lt.s32.totalorder %s21_s10, %s21_s10 }
   0x9   :  { %p185_p3 = scmp.ne.s32.totalorder %s21_s10, %s184_s18  ;;  %p190_p5 = scmp.lt.s32.totalorder %s184_s18, %s184_s18 }
   0xb   :  { %p191_p6 = por %p190_p5, %p189_p4 }
   0xd   :  { %p192_p7 = pnand %p191_p6, %p185_p3 }
   0xf   :  { %195 = shalt.err (!%p192_p7)
}
  0x10   :  { %23 = dma.hbm_to_vmem [thread:$0]  %s274_s0, 128, %s21_s10, [#allocation4]  }
  0x11   :  { %218 = dma.done.wait [#allocation4], 128  }
  0x12   :  { %219 = vsyncadd [#allocation4], 4294967168  ;;  %v223_v0 = vmov 0   ;;  %v65_v1 = vld [vmem:[%s275_s1] sm:$0x1]  ;;  %v64_v2 = vld [vmem:[#allocation3] sm:$0xff]  ;;  %v108_v10 = vlaneseq }
  0x13   :  { %168 = vset.pattern.permute.xlu1 %v223_v0  ;;  %66 = vxpose.xlu0.b32.start.end [1/1] (short) (narrow) %v65_v1, 8  ;;  %vm98_vm0 = vcmask 261120   ;;  %vm60_vm2 = vcmask 0   ;;  %v224_v15 = vmov 0.0   ;;  %s225_s0 = smov [#allocation6]  }
  0x14   :  { %v99_v3 = vsel %vm98_vm0, %v64_v2, -inf  ;;  %v109_v11 = vand.u32 127, %v108_v10  ;;  %61 = vst.msk [vmem:[#allocation2] sm:$0x1] %vm60_vm2, %v224_v15  ;;  %s150_s1 = sshll.u32 %s225_s0, 4  ;;  %s151_s1 = int_to_ptr.vmem [resolvable:$true] %s150_s1 }
  0x15   :  { %s196_s23 = scalar_lea.vmem %s151_s1, 16  ;;  %s200_s24 = scalar_lea.vmem %s151_s1, 32 }
  0x16   :  { %p197_p8 = scmp.ne.s32.totalorder %s151_s1, %s196_s23  ;;  %p201_p9 = scmp.lt.s32.totalorder %s151_s1, %s151_s1 }
  0x17   :  { %p202_p10 = scmp.lt.s32.totalorder %s200_s24, %s196_s23 }
  0x19   :  { %p203_p11 = por %p202_p10, %p201_p9 }
  0x1b   :  { %v135_v28 = vld [vmem:[#allocation2] sm:$0x1]  ;;  %p204_p12 = pnand %p203_p11, %p197_p8 }
  0x3c   :  { %169 = vset.pattern.permute.xlu0 %v223_v0 }
  0x40   :  { %100 = vmax.xlane.f32.xlu0 %v99_v3 }
  0x93   :  { %v82_v4 = vpop.trf.xlu0 }
  0x94   :  { %111 = vperm.xlu1 %168, %v82_v4  }
  0xcd   :  { %v101_v5 = vpop.xlane.xlu0 %100 }
  0xce   :  { %v102_v6 = vsub.f32 %v64_v2, %v101_v5 }
  0xd0   :  { %v103_v7 = vmul.f32 1.442695, %v102_v6 }
  0xd2   :  { %170 = vpow2.f32 %v103_v7 }
  0xdc   :  { %v171_v8 = vpop.eup %170 }
  0xdd   :  { %v105_v9 = vsel %vm98_vm0, %v171_v8, 0.0 }
  0xde   :  { %106 = vadd.xlane.f32.xlu1 %v105_v9 }
 0x113   :  { %v112_v12 = vpop.permute.xlu1 %111 }
 0x114   :  { %vm113_vm1 = vcmp.eq.s32.totalorder %v109_v11, %v112_v12 }
 0x115   :  { %v114_v13 = vsel %vm113_vm1, %v171_v8, 0.0 }
 0x116   :  { %v115_v14 = vsel %vm98_vm0, %v114_v13, 0.0 }
 0x117   :  { %116 = vadd.xlane.f32.xlu1 %v115_v14 }
 0x16b   :  { %v107_v16 = vpop.xlane.xlu1 %106 }
 0x16c   :  { %172 = vrcp.f32 %v107_v16 }
 0x176   :  { %v173_v17 = vpop.eup %172 }
 0x1a4   :  { %v117_v18 = vpop.xlane.xlu1 %116 }
 0x1a5   :  { %v119_v19 = vmul.f32 %v173_v17, %v117_v18 }
 0x1a7   :  { %v120_v20 = vmax.f32 %v119_v19, 1e-07 }
 0x1a9   :  { %v121_v21 = vmin.f32 %v120_v20, 0.9999999 }
 0x1ab   :  { %v127_v22 = vsub.f32 1.0, %v121_v21 }
 0x1ad   :  { %v129_v23 = vrot.slane %v127_v22, 4 }
 0x1af   :  { %v130_v24 = vadd.f32 %v129_v23, %v127_v22 }
 0x1b1   :  { %v131_v25 = vrot.slane %v130_v24, 2 }
 0x1b3   :  { %v132_v26 = vadd.f32 %v131_v25, %v130_v24 }
 0x1b5   :  { %v133_v27 = vrot.slane %v132_v26, 1 }
 0x1b7   :  { %v134_v29 = vadd.f32 %v133_v27, %v132_v26 }
 0x1b9   :  { %v136_v30 = vadd.f32 %v135_v28, %v134_v29 }
 0x1bb   :  { %138 = vst.msk [vmem:[#allocation2] sm:$0x1] %vm60_vm2, %v136_v30 }
 0x1c2   :  { %v142_v31 = vld [vmem:[#allocation2] sm:$0x1] }
 0x1c3   :  { %143 = vst.msk [vmem:[#allocation6] sm:$0x1] %vm60_vm2, %v142_v31 }
 0x1c4   :  { %207 = shalt.err (!%p204_p12)
}
 0x1c5   :  { %s208_s27 = scalar_lea.hbm %s276_s2, 16 }
 0x1c6   :  { %p209_p13 = scmp.ne.s32.totalorder %s276_s2, %s208_s27  ;;  %p212_p0 = scmp.lt.u32.totalorder %s208_s27, %s276_s2 }
 0x1c8   :  { %p214_p1 = pnand %p212_p0, %p209_p13 }
 0x1ca   :  { %217 = shalt.err (!%p214_p1)
}
 0x1cb   :  { %153 = dma.vmem_to_hbm [thread:$0]  %s151_s1, 16, %s276_s2, [#allocation5]  }
 0x1cc   :  { %220 = dma.done.wait [#allocation5], 16  }
 0x1cd   :  { %221 = vsyncadd [#allocation5], 4294967280 }
 0x1ce   :  { %157 = vsyncpa [#allocation4], 1 }
 0x1cf   :  { %158 = vsyncpa [#allocation5], 1 }

</bundles_post_ra>
